<compile_context>
chip_gen: v6e
topology: v6e:2x2x1
jax: 0.10.0
libtpu: 0.0.40
codegen_flags: <defaults>
</compile_context>

<pallas_src>
import jax
import jax.numpy as jnp
from jax.experimental import pallas as pl
from jax.experimental.pallas import tpu as pltpu


def _round_up(n, m):
    return ((n + m - 1) // m) * m


# ----------------------------- kernels --------------------------------------

def _resblock_kernel_shortcut(x_ref, w0_ref, b0_ref, w1_ref, b1_ref, ws_ref, o_ref):
    """Fused: relu -> fc_0 -> relu -> fc_1 -> + shortcut(x)."""
    x = x_ref[...]                                 # f32 row tile [tm, in_p]
    xc = x.astype(ws_ref.dtype)                    # MXU operand dtype
    x_s = jnp.dot(xc, ws_ref[...], preferred_element_type=jnp.float32)
    h = jnp.maximum(x, 0.0).astype(w0_ref.dtype)   # ReLU in f32, cast for MXU
    net = jnp.dot(h, w0_ref[...], preferred_element_type=jnp.float32) + b0_ref[...]
    a = jnp.maximum(net, 0.0).astype(w1_ref.dtype)
    dx = jnp.dot(a, w1_ref[...], preferred_element_type=jnp.float32) + b1_ref[...]
    o_ref[...] = (x_s + dx).astype(o_ref.dtype)


def _resblock_kernel_identity(x_ref, w0_ref, b0_ref, w1_ref, b1_ref, o_ref):
    """Fused: relu -> fc_0 -> relu -> fc_1 -> + x (identity shortcut)."""
    x = x_ref[...]                                 # f32 row tile [tm, in_p]
    h = jnp.maximum(x, 0.0).astype(w0_ref.dtype)
    net = jnp.dot(h, w0_ref[...], preferred_element_type=jnp.float32) + b0_ref[...]
    a = jnp.maximum(net, 0.0).astype(w1_ref.dtype)
    dx = jnp.dot(a, w1_ref[...], preferred_element_type=jnp.float32) + b1_ref[...]
    o_ref[...] = (x + dx).astype(o_ref.dtype)      # residual add in f32


# ----------------------------- wrapper ---------------------------------------

def resnet_block_fc(x, params, *, tm=512):
    """Apply the ResnetBlockFC forward pass with a fused Pallas TPU kernel.

    x: [..., size_in] float32.
    params: dict with pre-transposed weights:
        'w0' [in,h], 'b0' [1,h] (f32), 'w1' [h,out], 'b1' [1,out] (f32),
        optional 'ws' [in,out]. Weights may be f32 or bf16 (MXU operands);
        accumulation is always f32.
    """
    orig_shape = x.shape
    size_in = orig_shape[-1]
    size_h = params["w0"].shape[1]
    size_out = params["w1"].shape[1]
    has_shortcut = "ws" in params
    w_dtype = params["w0"].dtype

    # --- pad feature dims to lane (128) multiples: MXU-aligned, lane-dense out.
    size_in_p = _round_up(size_in, 128)
    size_h_p = _round_up(size_h, 128)
    size_out_p = _round_up(size_out, 128)

    def pad2(a, rows, cols):
        if a.shape == (rows, cols):
            return a
        return jnp.pad(a, ((0, rows - a.shape[0]), (0, cols - a.shape[1])))

    w0 = pad2(params["w0"], size_in_p, size_h_p)
    b0 = pad2(params["b0"].astype(jnp.float32), 1, size_h_p)
    w1 = pad2(params["w1"], size_h_p, size_out_p)
    b1 = pad2(params["b1"].astype(jnp.float32), 1, size_out_p)
    if has_shortcut:
        ws = pad2(params["ws"], size_in_p, size_out_p)

    xm = x.reshape(-1, size_in).astype(jnp.float32)
    M = xm.shape[0]

    # --- row-tile selection; ragged M handled with zero-padded rows.
    tm_eff = max(8, min(tm, _round_up(M, 8)))
    if _round_up(M, tm_eff) // tm_eff < 2 and M > 8:
        # ensure >= 2 grid steps so v7x's two TensorCores both get work
        tm_eff = max(8, _round_up(pl.cdiv(M, 2), 8))
    M_pad = _round_up(M, tm_eff)
    if M_pad != M or size_in_p != size_in:
        xm = jnp.pad(xm, ((0, M_pad - M), (0, size_in_p - size_in)))
    grid = (M_pad // tm_eff,)

    # --- VMEM budget: weights single-buffered, x/out row tiles double-buffered.
    w_item = jnp.dtype(w_dtype).itemsize
    weight_bytes = (size_in_p * size_h_p + size_h_p * size_out_p) * w_item
    weight_bytes += 4 * (size_h_p + size_out_p)  # f32 biases
    if has_shortcut:
        weight_bytes += size_in_p * size_out_p * w_item
    io_bytes = 2 * tm_eff * (size_in_p + size_out_p) * 4
    vmem_limit = int(min(100 * 2**20,
                         max(32 * 2**20, int((weight_bytes + io_bytes) * 1.5))))

    # --- scheduler hint (flops / bytes actually touched).
    flops = 2 * M_pad * (size_in_p * size_h_p + size_h_p * size_out_p)
    if has_shortcut:
        flops += 2 * M_pad * size_in_p * size_out_p
    bytes_accessed = (M_pad * (size_in_p + size_out_p) * 4) + weight_bytes
    cost = pl.CostEstimate(flops=flops, transcendentals=0,
                           bytes_accessed=bytes_accessed)

    row_spec_in = pl.BlockSpec((tm_eff, size_in_p), lambda i: (i, 0))
    row_spec_out = pl.BlockSpec((tm_eff, size_out_p), lambda i: (i, 0))
    # Grid-invariant operands: whole array resident in VMEM, no double-buffering.
    resident = pl.BlockSpec(memory_space=pltpu.MemorySpace.VMEM)

    if has_shortcut:  # learned linear shortcut (size_in != size_out)
        kernel = _resblock_kernel_shortcut
        in_specs = [row_spec_in, resident, resident, resident, resident, resident]
        args = (xm, w0, b0, w1, b1, ws)
    else:             # identity shortcut (size_in == size_out)
        kernel = _resblock_kernel_identity
        in_specs = [row_spec_in, resident, resident, resident, resident]
        args = (xm, w0, b0, w1, b1)

    out = pl.pallas_call(
        kernel,
        out_shape=jax.ShapeDtypeStruct((M_pad, size_out_p), jnp.float32),
        grid_spec=pltpu.PrefetchScalarGridSpec(
            num_scalar_prefetch=0,
            grid=grid,
            in_specs=in_specs,
            out_specs=row_spec_out,
        ),
        compiler_params=pltpu.CompilerParams(
            dimension_semantics=("parallel",),
            vmem_limit_bytes=vmem_limit,
        ),
        cost_estimate=cost,
    )(*args)

    return out[:M, :size_out].reshape(orig_shape[:-1] + (size_out,))


# ----------------------------- params / reference ----------------------------

def init_resnet_block_fc_params(key, size_in, size_out=None, size_h=None,
                                dtype=jnp.float32):
    """Parameter init mirroring the PyTorch module shapes.

    fc_0: Linear(size_in, size_h)        -> w0 [in,h] (pre-transposed), b0 [1,h]
    fc_1: Linear(size_h, size_out)       -> w1 zero-init (per module), b1 [1,out]
    shortcut: Linear(size_in, size_out, bias=False) iff size_in != size_out
    Weights are stored in `dtype` (f32 or bf16); biases stay f32.
    """
    if size_out is None:
        size_out = size_in
    if size_h is None:
        size_h = min(size_in, size_out)
    k0w, k0b, k1b, ksw = jax.random.split(key, 4)

    def kaiming_uniform(k, fan_in, shape):
        bound = 1.0 / jnp.sqrt(fan_in)
        return jax.random.uniform(k, shape, jnp.float32, -bound, bound)

    params = {
        "w0": kaiming_uniform(k0w, size_in, (size_in, size_h)).astype(dtype),
        "b0": kaiming_uniform(k0b, size_in, (1, size_h)),
        # nn.init.zeros_(self.fc_1.weight)
        "w1": jnp.zeros((size_h, size_out), dtype),
        "b1": kaiming_uniform(k1b, size_h, (1, size_out)),
    }
    if size_in != size_out:
        params["ws"] = kaiming_uniform(ksw, size_in, (size_in, size_out)).astype(dtype)
    return params


def _reference(x, params):
    """Pure-JAX f32 reference for correctness checking."""
    p = {k: v.astype(jnp.float32) for k, v in params.items()}
    h = jnp.maximum(x, 0.0)
    net = h @ p["w0"] + p["b0"]
    dx = jnp.maximum(net, 0.0) @ p["w1"] + p["b1"]
    x_s = x @ p["ws"] if "ws" in p else x
    return x_s + dx


# ----------------------------- self test --------------------------------------

if __name__ == "__main__":
    key = jax.random.PRNGKey(0)
    kx, kx3, kp1, kp2, kp3, kw1a, kw1b = jax.random.split(key, 7)

    # Case 1: size_in != size_out -> learned linear shortcut (f32).
    # fc_1 weight overridden to random (module zero-inits it) so the second
    # matmul path is actually exercised numerically.
    B, N, size_in, size_h, size_out = 2, 8, 32, 32, 64
    x = jax.random.normal(kx, (B, N, size_in), jnp.float32)
    params = init_resnet_block_fc_params(kp1, size_in, size_out, size_h)
    params["w1"] = jax.random.normal(kw1a, (size_h, size_out), jnp.float32) * 0.05
    y = jax.block_until_ready(resnet_block_fc(x, params))
    y_ref = _reference(x.reshape(-1, size_in), params).reshape(B, N, size_out)
    assert y.shape == (B, N, size_out)
    assert jnp.allclose(y, y_ref, atol=1e-4, rtol=1e-4), "case 1 mismatch"

    # Case 2: size_in == size_out -> identity shortcut, module-faithful init
    # (fc_1 weight zero -> dx = bias only).
    params2 = init_resnet_block_fc_params(kp2, size_in)
    y2 = jax.block_until_ready(resnet_block_fc(x, params2))
    y2_ref = _reference(x.reshape(-1, size_in), params2).reshape(B, N, size_in)
    assert y2.shape == (B, N, size_in)
    assert jnp.allclose(y2, y2_ref, atol=1e-4, rtol=1e-4), "case 2 mismatch"

    # Case 3: bf16 MXU operands, f32 accumulation, ragged M (300 rows).
    M3, d_in, d_h, d_out = 300, 192, 192, 256
    x3 = jax.random.normal(kx3, (M3, d_in), jnp.float32)
    params3 = init_resnet_block_fc_params(kp3, d_in, d_out, d_h, dtype=jnp.bfloat16)
    params3["w1"] = (jax.random.normal(kw1b, (d_h, d_out), jnp.float32) * 0.05
                     ).astype(jnp.bfloat16)
    y3 = jax.block_until_ready(resnet_block_fc(x3, params3, tm=256))
    y3_ref = _reference(x3, params3)
    assert y3.shape == (M3, d_out)
    assert jnp.allclose(y3, y3_ref, atol=5e-2, rtol=5e-2), "case 3 (bf16) mismatch"

    print("KERNEL_OK")
</pallas_src>

<mosaic_0001>
module attributes {stable_mosaic.version = 11 : i64} {
  func.func @_resblock_kernel_shortcut(%arg0: i32, %arg1: memref<8x128xf32, #tpu.memory_space<vmem>>, %arg2: memref<128x128xf32, #tpu.memory_space<vmem>>, %arg3: memref<1x128xf32, #tpu.memory_space<vmem>>, %arg4: memref<128x128xf32, #tpu.memory_space<vmem>>, %arg5: memref<1x128xf32, #tpu.memory_space<vmem>>, %arg6: memref<128x128xf32, #tpu.memory_space<vmem>>, %arg7: memref<8x128xf32, #tpu.memory_space<vmem>>) attributes {dimension_semantics = [#tpu.dimension_semantics<parallel>], iteration_bounds = array<i64: 2>, scalar_prefetch = 0 : i64, scratch_operands = 0 : i64, tpu.core_type = #tpu.core_type<tc>, window_params = [{transform_indices = @transform_0, window_bounds = array<i64: 8, 128>}, {pipeline_mode = #tpu.pipeline_mode<synchronous>, transform_indices = @transform_1, window_bounds = array<i64: 128, 128>}, {pipeline_mode = #tpu.pipeline_mode<synchronous>, transform_indices = @transform_2, window_bounds = array<i64: 1, 128>}, {pipeline_mode = #tpu.pipeline_mode<synchronous>, transform_indices = @transform_3, window_bounds = array<i64: 128, 128>}, {pipeline_mode = #tpu.pipeline_mode<synchronous>, transform_indices = @transform_4, window_bounds = array<i64: 1, 128>}, {pipeline_mode = #tpu.pipeline_mode<synchronous>, transform_indices = @transform_5, window_bounds = array<i64: 128, 128>}, {transform_indices = @transform_6, window_bounds = array<i64: 8, 128>}]} {
    %c0 = arith.constant 0 : index
    %c0_0 = arith.constant 0 : index
    %0 = vector.load %arg1[%c0, %c0_0] : memref<8x128xf32, #tpu.memory_space<vmem>>, vector<8x128xf32>
    %c0_1 = arith.constant 0 : index
    %c0_2 = arith.constant 0 : index
    %1 = vector.load %arg6[%c0_1, %c0_2] : memref<128x128xf32, #tpu.memory_space<vmem>>, vector<128x128xf32>
    %cst = arith.constant dense<0.000000e+00> : vector<8x128xf32>
    %2 = tpu.matmul %0, %1, %cst {dimension_numbers = #tpu.dot_dimension_numbers<[1], [0], [0], [1], [0, 0, 1, 1], [], []>} : vector<8x128xf32>, vector<128x128xf32>, vector<8x128xf32> -> vector<8x128xf32>
    %cst_3 = arith.constant 0.000000e+00 : f32
    %3 = vector.broadcast %cst_3 : f32 to vector<8x128xf32>
    %4 = arith.maximumf %0, %3 : vector<8x128xf32>
    %c0_4 = arith.constant 0 : index
    %c0_5 = arith.constant 0 : index
    %5 = vector.load %arg2[%c0_4, %c0_5] : memref<128x128xf32, #tpu.memory_space<vmem>>, vector<128x128xf32>
    %cst_6 = arith.constant dense<0.000000e+00> : vector<8x128xf32>
    %6 = tpu.matmul %4, %5, %cst_6 {dimension_numbers = #tpu.dot_dimension_numbers<[1], [0], [0], [1], [0, 0, 1, 1], [], []>} : vector<8x128xf32>, vector<128x128xf32>, vector<8x128xf32> -> vector<8x128xf32>
    %c0_7 = arith.constant 0 : index
    %c0_8 = arith.constant 0 : index
    %7 = vector.load %arg3[%c0_7, %c0_8] : memref<1x128xf32, #tpu.memory_space<vmem>>, vector<1x128xf32>
    %8 = vector.broadcast %7 : vector<1x128xf32> to vector<8x128xf32>
    %9 = arith.addf %6, %8 : vector<8x128xf32>
    %cst_9 = arith.constant 0.000000e+00 : f32
    %10 = vector.broadcast %cst_9 : f32 to vector<8x128xf32>
    %11 = arith.maximumf %9, %10 : vector<8x128xf32>
    %c0_10 = arith.constant 0 : index
    %c0_11 = arith.constant 0 : index
    %12 = vector.load %arg4[%c0_10, %c0_11] : memref<128x128xf32, #tpu.memory_space<vmem>>, vector<128x128xf32>
    %cst_12 = arith.constant dense<0.000000e+00> : vector<8x128xf32>
    %13 = tpu.matmul %11, %12, %cst_12 {dimension_numbers = #tpu.dot_dimension_numbers<[1], [0], [0], [1], [0, 0, 1, 1], [], []>} : vector<8x128xf32>, vector<128x128xf32>, vector<8x128xf32> -> vector<8x128xf32>
    %c0_13 = arith.constant 0 : index
    %c0_14 = arith.constant 0 : index
    %14 = vector.load %arg5[%c0_13, %c0_14] : memref<1x128xf32, #tpu.memory_space<vmem>>, vector<1x128xf32>
    %15 = vector.broadcast %14 : vector<1x128xf32> to vector<8x128xf32>
    %16 = arith.addf %13, %15 : vector<8x128xf32>
    %17 = arith.addf %2, %16 : vector<8x128xf32>
    %c0_15 = arith.constant 0 : index
    %c0_16 = arith.constant 0 : index
    %18 = vector.load %arg7[%c0_15, %c0_16] : memref<8x128xf32, #tpu.memory_space<vmem>>, vector<8x128xf32>
    tpu.vector_store %arg7[%c0_15, %c0_16], %17 {strides = array<i32>} : memref<8x128xf32, #tpu.memory_space<vmem>>, vector<8x128xf32>,
    return
  }
  func.func @transform_0(%arg0: i32) -> (i32, i32) {
    %c0_i32 = arith.constant 0 : i32
    %c0_i32_0 = arith.constant 0 : i32
    return %arg0, %c0_i32 : i32, i32
  }
  func.func @transform_1(%arg0: i32) -> (i32, i32) {
    %c0_i32 = arith.constant 0 : i32
    %c0_i32_0 = arith.constant 0 : i32
    %c0_i32_1 = arith.constant 0 : i32
    return %c0_i32, %c0_i32_0 : i32, i32
  }
  func.func @transform_2(%arg0: i32) -> (i32, i32) {
    %c0_i32 = arith.constant 0 : i32
    %c0_i32_0 = arith.constant 0 : i32
    %c0_i32_1 = arith.constant 0 : i32
    return %c0_i32, %c0_i32_0 : i32, i32
  }
  func.func @transform_3(%arg0: i32) -> (i32, i32) {
    %c0_i32 = arith.constant 0 : i32
    %c0_i32_0 = arith.constant 0 : i32
    %c0_i32_1 = arith.constant 0 : i32
    return %c0_i32, %c0_i32_0 : i32, i32
  }
  func.func @transform_4(%arg0: i32) -> (i32, i32) {
    %c0_i32 = arith.constant 0 : i32
    %c0_i32_0 = arith.constant 0 : i32
    %c0_i32_1 = arith.constant 0 : i32
    return %c0_i32, %c0_i32_0 : i32, i32
  }
  func.func @transform_5(%arg0: i32) -> (i32, i32) {
    %c0_i32 = arith.constant 0 : i32
    %c0_i32_0 = arith.constant 0 : i32
    %c0_i32_1 = arith.constant 0 : i32
    return %c0_i32, %c0_i32_0 : i32, i32
  }
  func.func @transform_6(%arg0: i32) -> (i32, i32) {
    %c0_i32 = arith.constant 0 : i32
    %c0_i32_0 = arith.constant 0 : i32
    return %arg0, %c0_i32 : i32, i32
  }
}

</mosaic_0001>

<bundles_post_ra>
// kernel: tpu_custom_call.1
= control target key start
LH: loop header
LB: loop body
LE: loop exit
PB: predicated region body
PF: predicated region fallthrough
CT: control target
= control target key end

     0   :  { %s1429_s0 = inlined_call_operand.hbm [shape: f32[16,128], index: 0, kind: input, shape index: {}]   ;;  %s1430_s1 = inlined_call_operand.hbm [shape: f32[128,128], index: 1, kind: input, shape index: {}]   ;;  %s1431_s2 = inlined_call_operand.vmem [shape: f32[1,128], index: 2, kind: input, shape index: {}]   ;;  %s1432_s3 = inlined_call_operand.hbm [shape: f32[128,128], index: 3, kind: input, shape index: {}]   ;;  %s1433_s4 = inlined_call_operand.vmem [shape: f32[1,128], index: 4, kind: input, shape index: {}]   ;;  %s1434_s5 = inlined_call_operand.hbm [shape: f32[128,128], index: 5, kind: input, shape index: {}]   ;;  %s1435_s6 = inlined_call_operand.hbm [shape: f32[16,128], index: 6, kind: output, shape index: {}]  }
   0x1   :  { %1440 = sst [smem:[#allocation15_spill]] %s1430_s1 }
   0x2   :  { %11 = vsyncpa [#allocation3], 0 }
   0x3   :  { %13 = vsyncpa [#allocation3 + $0x1], 0 }
   0x4   :  { %14 = vsyncpa [#allocation6], 0 }
   0x5   :  { %15 = vsyncpa [#allocation9], 0 }
   0x6   :  { %16 = vsyncpa [#allocation4], 0 }
   0x7   :  { %18 = vsyncpa [#allocation4 + $0x1], 0  ;;  %s1181_s21 = smov 0   ;;  %s1183_s22 = smov 0  }
   0x8   :  { %s1185_s23 = smov 0   ;;  %s1187_s24 = smov 0  }
   0x9 LB: > { %s1202_s25 = sadd.s32 4294967295, %s1135_s24   ;;  %s700_s26 = sadd.s32 4294967294, %s1135_s24   ;;  %s1135_s24 = sphi %s1187_s24, %s1461_s24   ;;  %s1131_s23 = sphi %s1185_s23, %s1460_s23   ;;  %s1127_s22 = sphi %s1183_s22, %s1459_s22   ;;  %s1123_s21 = sphi %s1181_s21, %s1458_s21  }
   0xa   : > { %p44_p0 = scmp.ne.s32.totalorder %s1127_s22, %s1123_s21  ;;  %p1436_p1 = scmp.eq.s32.totalorder %s1202_s25, 0 }
   0xb   : > { %p179_p3 = scmp.eq.s32.totalorder %s700_s26, 1  ;;  %p701_p5 = scmp.ge.s32.totalorder %s1135_s24, 1 }
   0xc   : > { %p1211_p4 = por %p1436_p1, %p44_p0  ;;  %p186_p7 = scmp.lt.s32.totalorder %s1135_s24, 3 }
   0xd   : > { %p1216_p6 = por %p179_p3, %p44_p0  ;;  %s1137_s30 = smov [#allocation5]  }
   0xe   : > { %s1441_s27 = scalar_select %p1211_p4, 1, 0 }
   0xf   : > { %s1442_s28 = scalar_select %p1216_p6, 1, 0 }
  0x10   : > { %p1221_p8 = pnand %p701_p5, %p186_p7  ;;  %s198_s7 = sshll.u32 %s1137_s30, 4  ;;  %s199_s7 = int_to_ptr.vmem [resolvable:$true] %s198_s7 }
  0x11   : > { %s1138_s9 = smov [#allocation7]   ;;  %s1139_s11 = smov [#allocation8]  }
  0x12   : > { %s1443_s29 = scalar_select %p1221_p8, 1, 0 }
  0x13   : > { %p892_p9 = pneg %p1221_p8  ;;  %s214_s10 = sshll.u32 %s1138_s9, 4  ;;  %s215_s10 = int_to_ptr.vmem [resolvable:$true] %s214_s10 }
  0x14   : > { %s230_s12 = sshll.u32 %s1139_s11, 4  ;;  %s968_s13 = scalar_lea.vmem %s199_s7, 2048  ;;  %s231_s12 = int_to_ptr.vmem [resolvable:$true] %s230_s12 }
  0x15   : > { %p1230_p11 = pnand %p892_p9, %p1436_p1  ;;  %p969_p13 = scmp.ne.s32.totalorder %s199_s7, %s968_s13 }
  0x16   : > { %p976_p5 = scmp.lt.s32.totalorder %s199_s7, %s199_s7  ;;  %p977_p7 = scmp.lt.s32.totalorder %s968_s13, %s968_s13 }
  0x17   : > { %p959_p12 = pneg %p1230_p11 }
  0x18   : > { %p978_p9 = por %p977_p7, %p976_p5 }
  0x19   : > { %p971_p0 = pnand %p969_p13, %p959_p12 }
  0x1b   : > { %p972_p3 = pneg %p971_p0 }
  0x1d   : > { %p979_p10 = pnand %p978_p9, %p972_p3 }
  0x1f   : > { %982 = shalt.err (!%p979_p10)
}
  0x20   : > { %s1140_s14 = smov 128   ;;  %s1141_s15 = smov 8  }
  0x21   : > { %s1445_s1 = sld [smem:[#allocation15_spill]]  ;;  %s994_s18 = scalar_lea.vmem %s215_s10, 2048 }
  0x22   : > { %p995_p1 = scmp.ne.s32.totalorder %s215_s10, %s994_s18  ;;  %p1002_p2 = scmp.lt.s32.totalorder %s215_s10, %s215_s10 }
  0x23   : > { %p1003_p6 = scmp.lt.s32.totalorder %s994_s18, %s994_s18 }
  0x24   : > { %p997_p13 = pnand %p995_p1, %p959_p12 }
  0x25   : > { %p1004_p5 = por %p1003_p6, %p1002_p2 }
  0x26   : > { %p998_p0 = pneg %p997_p13 }
  0x27   : > { %895 = dma.hbm_to_vmem [thread:$0]  (!%p1230_p11), %s1445_s1, 2048, %s199_s7, [#allocation6], %s1140_s14, %s1140_s14, %s1141_s15  }
  0x28   : > { %p1005_p3 = pnand %p1004_p5, %p998_p0 }
  0x2a   : > { %1008 = shalt.err (!%p1005_p3)
}
  0x2b   : > { %898 = dma.hbm_to_vmem [thread:$0]  (!%p1230_p11), %s1432_s3, 2048, %s215_s10, [#allocation6], %s1140_s14, %s1140_s14, %s1141_s15  }
  0x2c   : > { %s1020_s26 = scalar_lea.vmem %s231_s12, 2048  ;;  %p1028_p9 = scmp.lt.s32.totalorder %s231_s12, %s231_s12 }
  0x2d   : > { %p1021_p10 = scmp.ne.s32.totalorder %s231_s12, %s1020_s26  ;;  %p1029_p13 = scmp.lt.s32.totalorder %s1020_s26, %s1020_s26 }
  0x2f   : > { %p1023_p7 = pnand %p1021_p10, %p959_p12  ;;  %p1030_p4 = por %p1029_p13, %p1028_p9 }
  0x31   : > { %p1024_p1 = pneg %p1023_p7 }
  0x33   : > { %p1031_p2 = pnand %p1030_p4, %p1024_p1 }
  0x35   : > { %1034 = shalt.err (!%p1031_p2)
}
  0x36   : > { %901 = dma.hbm_to_vmem [thread:$0]  (!%p1230_p11), %s1434_s5, 2048, %s231_s12, [#allocation9], %s1140_s14, %s1140_s14, %s1141_s15  }
  0x37   : > { %s1261_s9 = sadd.s32 1, %s1135_s24   ;;  %s31_s8 = sadd.s32 1, %s1131_s23 }
  0x38   : > { %s28_s10 = ssub.s32 %s1135_s24, %s1261_s9  ;;  %p38_p6 = scmp.ne.s32.totalorder %s1131_s23, %s1127_s22 }
  0x39   : > { %p29_p4 = scmp.eq.s32.totalorder %s28_s10, 0  ;;  %p39_p12 = scmp.eq.s32.totalorder %s1135_s24, 0 }
  0x3a   : > { %p913_p0 = scmp.lt.s32.totalorder %s1135_s24, 2  ;;  %p1446_p3 = scmp.eq.s32.totalorder %s1202_s25, 1 }
  0x3b   : > { %s1271_s11 = scalar_select %p29_p4, %s1131_s23, %s31_s8  }
  0x3c   : > { %p40_p5 = por %p39_p12, %p38_p6  ;;  %p1275_p10 = por %p1446_p3, %p38_p6 }
  0x3d   : > { %s244_s16 = sand.u32 1, %s1131_s23   ;;  %s707_s17 = sshll.u32 %s1135_s24, 7 }
  0x3e   : > { %s1447_s13 = scalar_select %p1275_p10, 1, 0 }
  0x3f   : > { %s706_s12 = sshll.u32 %s244_s16, 3  ;;  %s1284_s18 = scalar_lea.hbm %s1429_s0, %s707_s17 }
  0x40   : > { %s248_s19 = scalar_lea.vmem [#allocation2], %s706_s12  ;;  %p1286_p11 = pnand %p913_p0, %p40_p5 }
  0x41   : > { %s255_s20 = sshll.u32 %s248_s19, 4  ;;  %s245_s30 = scalar_lea.sflag [#allocation3], %s244_s16  ;;  %s256_s20 = int_to_ptr.vmem [resolvable:$true] %s255_s20 }
  0x42   : > { %s1035_s7 = scalar_lea.hbm %s1284_s18, 128  ;;  %p1037_p1 = pneg %p1286_p11 }
  0x43   : > { %p1036_p7 = scmp.ne.s32.totalorder %s1284_s18, %s1035_s7  ;;  %s1040_s17 = scalar_lea.hbm %s1429_s0, 256 }
  0x44   : > { %p1041_p2 = scmp.lt.s32.totalorder %s1284_s18, %s1429_s0  ;;  %p1042_p4 = scmp.lt.s32.totalorder %s1040_s17, %s1035_s7 }
  0x45   : > { %p1038_p9 = pnand %p1037_p1, %p1036_p7 }
  0x46   : > { %p1043_p6 = por %p1042_p4, %p1041_p2 }
  0x47   : > { %p1039_p13 = pneg %p1038_p9 }
  0x49   : > { %p1044_p12 = pnand %p1043_p6, %p1039_p13 }
  0x4b   : > { %1047 = shalt.err (!%p1044_p12)
}
  0x4c   : > { %s1048_s15 = scalar_lea.vmem %s256_s20, 128  ;;  %s1142_s16 = smov [#allocation2]  }
  0x4d   : > { %p1049_p0 = scmp.ne.s32.totalorder %s256_s20, %s1048_s15  ;;  %s1053_s19 = sshll.u32 %s1142_s16, 4  ;;  %s1054_s19 = int_to_ptr.vmem [resolvable:$false] %s1053_s19 }
  0x4e   : > { %s1055_s1 = scalar_lea.vmem %s1054_s19, 256  ;;  %p1056_p7 = scmp.lt.s32.totalorder %s256_s20, %s1054_s19 }
  0x4f   : > { %p1051_p5 = pnand %p1049_p0, %p1037_p1  ;;  %p1057_p9 = scmp.lt.s32.totalorder %s1055_s1, %s1048_s15 }
  0x51   : > { %p1052_p3 = pneg %p1051_p5  ;;  %p1058_p10 = por %p1057_p9, %p1056_p7 }
  0x53   : > { %p1059_p8 = pnand %p1058_p10, %p1052_p3 }
  0x55   : > { %1062 = shalt.err (!%p1059_p8)
}
  0x56   : > { %905 = dma.hbm_to_vmem [thread:$0]  (!%p1286_p11), %s1284_s18, 128, %s256_s20, %s245_s30  }
  0x57   : > { %p1449_p13 = scmp.ne.s32.totalorder %s1443_s29, 0 }
  0x58   : > { %s1307_s7 = sand.u32 (!%p1449_p13), 1, %s1127_s22   ;;  %p1450_p8 = scmp.ne.s32.totalorder (!%p1449_p13), %s1441_s27, 0 }
  0x59   : > { %264 = sbr.rel (%p1449_p13) target bundleno = 542 (0x21e), region = 44  ;;  %s709_s10 = sshll.u32 (!%p1449_p13), %s1307_s7, 3 }
  0x5a   : > { %s267_s8 = scalar_lea.sflag (!%p1449_p13), [#allocation3], %s1307_s7  ;;  %s1313_s1 = scalar_lea.vmem (!%p1449_p13), [#allocation2], %s709_s10 }
  0x5e   : > { %1106 = dma.done.wait (%p1450_p8), %s267_s8, 128  }
  0x5f   : > { %1108 = vsyncadd (%p1450_p8), %s267_s8, 4294967168  ;;  %p1451_p10 = scmp.eq.s32.totalorder %s1202_s25, 0 }
  0x61   : > { %1110 = dma.done.wait (%p1451_p10), [#allocation6], 4096   ;;  %p1452_p11 = pmov %p1451_p10 }
  0x62   : > { %p1453_p1 = pmov %p1451_p10 }
  0x63   : > { %1112 = vsyncadd (%p1452_p11), [#allocation6], 4294963200 }
  0x64   : > { %1114 = dma.done.wait (%p1453_p1), [#allocation9], 2048   ;;  %p1454_p2 = pmov %p1453_p1 }
  0x65   : > { %v1143_v0 = vmov 0.0   ;;  %vm1144_vm0 = vmmov 0   ;;  %v344_v1 = vld [vmem:[#allocation5 + $0x78] sm:$0xff]  ;;  %v343_v2 = vld [vmem:[#allocation5 + $0x70] sm:$0xff]  ;;  %v342_v3 = vld [vmem:[#allocation5 + $0x68] sm:$0xff]  ;;  %s717_s26 = sshll.u32 %s1202_s25, 7 }
  0x66   : > { %1116 = vsyncadd (%p1454_p2), [#allocation9], 4294965248  ;;  %771 = vmatprep.subr.mxu0 %v1143_v0  ;;  %803 = vmatprep.mubr.msk.f32.mxu0 %vm1144_vm0, %v1143_v0  ;;  %v341_v4 = vld [vmem:[#allocation5 + $0x60] sm:$0xff]  ;;  %v438_v5 = vld [vmem:[#allocation7 + $0x78] sm:$0xff]  ;;  %s310_s30 = scalar_lea.vmem [#allocation10], %s709_s10  ;;  %s599_s15 = scalar_lea.hbm %s1435_s6, %s717_s26 }
  0x67   : > { %806 = vmatprep.subr.mxu1 %v1143_v0  ;;  %838 = vmatprep.mubr.msk.f32.mxu1 %vm1144_vm0, %v1143_v0  ;;  %v340_v6 = vld [vmem:[#allocation5 + $0x58] sm:$0xff]  ;;  %v437_v7 = vld [vmem:[#allocation7 + $0x70] sm:$0xff]  ;;  %v436_v8 = vld [vmem:[#allocation7 + $0x68] sm:$0xff]  ;;  %s601_s17 = sshll.u32 %s310_s30, 4  ;;  %s588_s16 = scalar_lea.sflag [#allocation4], %s1307_s7  ;;  %s602_s17 = int_to_ptr.vmem [resolvable:$true] %s601_s17 }
  0x68   : > { %772 = vmatpush3.msra.mxu0 %v344_v1  ;;  %807 = vmatpush3.msra.mxu1 %v438_v5  ;;  %v339_v9 = vld [vmem:[#allocation5 + $0x50] sm:$0xff]  ;;  %v435_v10 = vld [vmem:[#allocation7 + $0x60] sm:$0xff]  ;;  %v338_v11 = vld [vmem:[#allocation5 + $0x48] sm:$0xff]  ;;  %s1063_s19 = scalar_lea.vmem %s602_s17, 128  ;;  %p1455_p6 = scmp.ne.s32.totalorder %s1447_s13, 0 }
  0x69   : > { %773 = vmatprep.subr.mxu0 %v1143_v0  ;;  %808 = vmatprep.subr.mxu1 %v1143_v0  ;;  %v434_v12 = vld [vmem:[#allocation7 + $0x58] sm:$0xff]  ;;  %v337_v13 = vld [vmem:[#allocation5 + $0x40] sm:$0xff]  ;;  %v433_v14 = vld [vmem:[#allocation7 + $0x50] sm:$0xff]  ;;  %p1064_p4 = scmp.ne.s32.totalorder %s602_s17, %s1063_s19  ;;  %s1145_s8 = smov [#allocation10]  }
  0x6a   : > { %774 = vmatpush3.msra.mxu0 %v343_v2  ;;  %809 = vmatpush3.msra.mxu1 %v437_v7  ;;  %v336_v15 = vld [vmem:[#allocation5 + $0x38] sm:$0xff]  ;;  %v432_v16 = vld [vmem:[#allocation7 + $0x48] sm:$0xff]  ;;  %v335_v17 = vld [vmem:[#allocation5 + $0x30] sm:$0xff]  ;;  %s1067_s25 = sshll.u32 %s1145_s8, 4  ;;  %s1068_s25 = int_to_ptr.vmem [resolvable:$false] %s1067_s25 }
  0x6b   : > { %775 = vmatprep.subr.mxu0 %v1143_v0  ;;  %810 = vmatprep.subr.mxu1 %v1143_v0  ;;  %v431_v18 = vld [vmem:[#allocation7 + $0x40] sm:$0xff]  ;;  %v334_v19 = vld [vmem:[#allocation5 + $0x28] sm:$0xff]  ;;  %v430_v20 = vld [vmem:[#allocation7 + $0x38] sm:$0xff]  ;;  %p1065_p12 = pnand %p1064_p4, %p1455_p6  ;;  %s1069_s10 = scalar_lea.vmem %s1068_s25, 256 }
  0x6c   : > { %776 = vmatpush3.msra.mxu0 %v342_v3  ;;  %811 = vmatpush3.msra.mxu1 %v436_v8  ;;  %v333_v21 = vld [vmem:[#allocation5 + $0x20] sm:$0xff]  ;;  %v429_v22 = vld [vmem:[#allocation7 + $0x30] sm:$0xff]  ;;  %v332_v23 = vld [vmem:[#allocation5 + $0x18] sm:$0xff]  ;;  %p1070_p5 = scmp.lt.s32.totalorder %s602_s17, %s1068_s25  ;;  %p1071_p3 = scmp.lt.s32.totalorder %s1069_s10, %s1063_s19 }
  0x6d   : > { %777 = vmatprep.subr.mxu0 %v1143_v0  ;;  %812 = vmatprep.subr.mxu1 %v1143_v0  ;;  %v428_v24 = vld [vmem:[#allocation7 + $0x28] sm:$0xff]  ;;  %v331_v25 = vld [vmem:[#allocation5 + $0x10] sm:$0xff]  ;;  %v427_v27 = vld [vmem:[#allocation7 + $0x20] sm:$0xff]  ;;  %p1066_p0 = pneg %p1065_p12 }
  0x6e   : > { %778 = vmatpush3.msra.mxu0 %v341_v4  ;;  %813 = vmatpush3.msra.mxu1 %v435_v10  ;;  %v1355_v26 = vld [vmem:[%s1313_s1] sm:$0xff]  ;;  %v330_v28 = vld [vmem:[#allocation5 + $0x8] sm:$0xff]  ;;  %v329_v30 = vld [vmem:[#allocation5] sm:$0xff]  ;;  %p1072_p7 = por %p1071_p3, %p1070_p5 }
  0x6f   : > { %779 = vmatprep.subr.mxu0 %v1143_v0  ;;  %814 = vmatprep.subr.mxu1 %v1143_v0  ;;  %v426_v29 = vld [vmem:[#allocation7 + $0x18] sm:$0xff]  ;;  %v328_v31 = vmax.f32 %v1355_v26, 0.0  ;;  %v326_v33 = vld [vmem:[#allocation8 + $0x70] sm:$0xff]  ;;  %v325_v34 = vld [vmem:[#allocation8 + $0x68] sm:$0xff] }
  0x70   : > { %780 = vmatpush3.msra.mxu0 %v340_v6  ;;  %815 = vmatpush3.msra.mxu1 %v434_v12  ;;  %v327_v32 = vld [vmem:[#allocation8 + $0x78] sm:$0xff]  ;;  %v324_v35 = vld [vmem:[#allocation8 + $0x60] sm:$0xff]  ;;  %v322_v37 = vld [vmem:[#allocation8 + $0x50] sm:$0xff]  ;;  %p1073_p9 = pnand %p1072_p7, %p1066_p0 }
  0x71   : > { %781 = vmatprep.subr.mxu0 %v1143_v0  ;;  %816 = vmatprep.subr.mxu1 %v1143_v0  ;;  %v323_v36 = vld [vmem:[#allocation8 + $0x58] sm:$0xff]  ;;  %v321_v38 = vld [vmem:[#allocation8 + $0x48] sm:$0xff]  ;;  %v320_v39 = vld [vmem:[#allocation8 + $0x40] sm:$0xff] }
  0x72   : > { %782 = vmatpush3.msra.mxu0 %v339_v9  ;;  %817 = vmatpush3.msra.mxu1 %v433_v14  ;;  %v319_v40 = vld [vmem:[#allocation8 + $0x38] sm:$0xff]  ;;  %v318_v41 = vld [vmem:[#allocation8 + $0x30] sm:$0xff]  ;;  %v317_v42 = vld [vmem:[#allocation8 + $0x28] sm:$0xff] }
  0x73   : > { %783 = vmatprep.subr.mxu0 %v1143_v0  ;;  %818 = vmatprep.subr.mxu1 %v1143_v0  ;;  %v316_v43 = vld [vmem:[#allocation8 + $0x20] sm:$0xff]  ;;  %v315_v44 = vld [vmem:[#allocation8 + $0x18] sm:$0xff]  ;;  %v425_v45 = vld [vmem:[#allocation7 + $0x10] sm:$0xff] }
  0x74   : > { %784 = vmatpush3.msra.mxu0 %v338_v11  ;;  %819 = vmatpush3.msra.mxu1 %v432_v16  ;;  %v314_v46 = vld [vmem:[#allocation8 + $0x10] sm:$0xff]  ;;  %v424_v47 = vld [vmem:[#allocation7 + $0x8] sm:$0xff]  ;;  %v423_v49 = vld [vmem:[#allocation7] sm:$0xff] }
  0x75   : > { %785 = vmatprep.subr.mxu0 %v1143_v0  ;;  %820 = vmatprep.subr.mxu1 %v1143_v0  ;;  %v313_v48 = vld [vmem:[#allocation8 + $0x8] sm:$0xff]  ;;  %v312_v50 = vld [vmem:[#allocation8] sm:$0xff]  ;;  %v714_v51 = vld [vmem:[%s1431_s2] ss:$0 sm:$0xff] }
  0x76   : > { %786 = vmatpush3.msra.mxu0 %v337_v13  ;;  %821 = vmatpush3.msra.mxu1 %v431_v18  ;;  %v715_v58 = vld [vmem:[%s1433_s4] ss:$0 sm:$0xff] }
  0x77   : > { %787 = vmatprep.subr.mxu0 %v1143_v0  ;;  %822 = vmatprep.subr.mxu1 %v1143_v0 }
  0x78   : > { %788 = vmatpush3.msra.mxu0 %v336_v15  ;;  %823 = vmatpush3.msra.mxu1 %v430_v20 }
  0x79   : > { %789 = vmatprep.subr.mxu0 %v1143_v0  ;;  %824 = vmatprep.subr.mxu1 %v1143_v0 }
  0x7a   : > { %790 = vmatpush3.msra.mxu0 %v335_v17  ;;  %825 = vmatpush3.msra.mxu1 %v429_v22 }
  0x7b   : > { %791 = vmatprep.subr.mxu0 %v1143_v0  ;;  %826 = vmatprep.subr.mxu1 %v1143_v0 }
  0x7c   : > { %792 = vmatpush3.msra.mxu0 %v334_v19  ;;  %827 = vmatpush3.msra.mxu1 %v428_v24 }
  0x7d   : > { %793 = vmatprep.subr.mxu0 %v1143_v0  ;;  %828 = vmatprep.subr.mxu1 %v1143_v0 }
  0x7e   : > { %794 = vmatpush3.msra.mxu0 %v333_v21  ;;  %829 = vmatpush3.msra.mxu1 %v427_v27 }
  0x7f   : > { %795 = vmatprep.subr.mxu0 %v1143_v0  ;;  %830 = vmatprep.subr.mxu1 %v1143_v0 }
  0x80   : > { %796 = vmatpush3.msra.mxu0 %v332_v23  ;;  %831 = vmatpush3.msra.mxu1 %v426_v29 }
  0x81   : > { %797 = vmatprep.subr.mxu0 %v1143_v0  ;;  %832 = vmatprep.subr.mxu1 %v1143_v0 }
  0x82   : > { %798 = vmatpush3.msra.mxu0 %v331_v25  ;;  %833 = vmatpush3.msra.mxu1 %v425_v45 }
  0x83   : > { %799 = vmatprep.subr.mxu0 %v1143_v0  ;;  %834 = vmatprep.subr.mxu1 %v1143_v0 }
  0x84   : > { %800 = vmatpush3.msra.mxu0 %v330_v28  ;;  %835 = vmatpush3.msra.mxu1 %v424_v47 }
  0x85   : > { %801 = vmatprep.subr.mxu0 %v1143_v0  ;;  %836 = vmatprep.subr.mxu1 %v1143_v0 }
  0x86   : > { %802 = vmatpush3.msra.mxu0 %v329_v30  ;;  %837 = vmatpush3.msra.mxu1 %v423_v49 }
  0x87   : > { %804 = vmatmul.mubr.f32.vlgmr.msra.gmra.mxu0 %v328_v31  ;;  %841 = vmatprep.subr.mxu0 %v1143_v0 }
  0x88   : > { %842 = vmatpush3.msra.mxu0 %v327_v32  ;;  %873 = vmatprep.mubr.msk.f32.mxu0 %vm1144_vm0, %v1143_v0 }
  0x89   : > { %843 = vmatprep.subr.mxu0 %v1143_v0 }
  0x8a   : > { %844 = vmatpush3.msra.mxu0 %v326_v33 }
  0x8b   : > { %845 = vmatprep.subr.mxu0 %v1143_v0 }
  0x8c   : > { %846 = vmatpush3.msra.mxu0 %v325_v34 }
  0x8d   : > { %847 = vmatprep.subr.mxu0 %v1143_v0 }
  0x8e   : > { %848 = vmatpush3.msra.mxu0 %v324_v35 }
  0x8f   : > { %849 = vmatprep.subr.mxu0 %v1143_v0 }
  0x90   : > { %850 = vmatpush3.msra.mxu0 %v323_v36 }
  0x91   : > { %851 = vmatprep.subr.mxu0 %v1143_v0 }
  0x92   : > { %852 = vmatpush3.msra.mxu0 %v322_v37 }
  0x93   : > { %853 = vmatprep.subr.mxu0 %v1143_v0 }
  0x94   : > { %854 = vmatpush3.msra.mxu0 %v321_v38 }
  0x95   : > { %855 = vmatprep.subr.mxu0 %v1143_v0 }
  0x96   : > { %856 = vmatpush3.msra.mxu0 %v320_v39 }
  0x97   : > { %857 = vmatprep.subr.mxu0 %v1143_v0 }
  0x98   : > { %858 = vmatpush3.msra.mxu0 %v319_v40 }
  0x99   : > { %859 = vmatprep.subr.mxu0 %v1143_v0 }
  0x9a   : > { %860 = vmatpush3.msra.mxu0 %v318_v41 }
  0x9b   : > { %861 = vmatprep.subr.mxu0 %v1143_v0 }
  0x9c   : > { %862 = vmatpush3.msra.mxu0 %v317_v42 }
  0x9d   : > { %863 = vmatprep.subr.mxu0 %v1143_v0 }
  0x9e   : > { %864 = vmatpush3.msra.mxu0 %v316_v43 }
  0x9f   : > { %865 = vmatprep.subr.mxu0 %v1143_v0 }
  0xa0   : > { %866 = vmatpush3.msra.mxu0 %v315_v44 }
  0xa1   : > { %867 = vmatprep.subr.mxu0 %v1143_v0 }
  0xa2   : > { %868 = vmatpush3.msra.mxu0 %v314_v46 }
  0xa3   : > { %869 = vmatprep.subr.mxu0 %v1143_v0 }
  0xa4   : > { %870 = vmatpush3.msra.mxu0 %v313_v48 }
  0xa5   : > { %871 = vmatprep.subr.mxu0 %v1143_v0 }
  0xa6   : > { %872 = vmatpush3.msra.mxu0 %v312_v50 }
  0xa7   : > { %874 = vmatmul.mubr.f32.vlgmr.msra.gmra.mxu0 %v1355_v26 }
 0x147   : > { %v418_v52 = vpop.f32.mrf.mxu0 }
 0x148   : > { %v419_v53 = vadd.f32 %v714_v51, %v418_v52 }
 0x149   : > { %v805_v54 = vpop.f32.mrf.mxu0 }
 0x14a   : > { %v422_v55 = vmax.f32 %v419_v53, 0.0 }
 0x14c   : > { %839 = vmatmul.mubr.f32.vlgmr.msra.gmra.mxu1 %v422_v55 }
 0x167   : > { %v582_v56 = vpop.f32.mrf.mxu0 }
 0x169   : > { %v875_v57 = vpop.f32.mrf.mxu0 }
 0x20c   : > { %v512_v59 = vpop.f32.mrf.mxu1 }
 0x20d   : > { %v513_v60 = vadd.f32 %v715_v58, %v512_v59 }
 0x20e   : > { %v840_v61 = vpop.f32.mrf.mxu1 }
 0x20f   : > { %v583_v62 = vadd.f32 %v582_v56, %v513_v60 }
 0x211   : > { %586 = vst [vmem:[%s310_s30] sm:$0xff] %v583_v62 }
 0x212   : > { %1076 = shalt.err (!%p1073_p9)
}
 0x213   : > { %s1077_s1 = scalar_lea.hbm %s599_s15, 128  ;;  %s1081_s29 = scalar_lea.hbm %s1435_s6, 256 }
 0x214   : > { %p1078_p13 = scmp.ne.s32.totalorder %s599_s15, %s1077_s1  ;;  %p1082_p11 = scmp.lt.s32.totalorder %s599_s15, %s1435_s6 }
 0x215   : > { %p1083_p1 = scmp.lt.s32.totalorder %s1081_s29, %s1077_s1 }
 0x216   : > { %p1079_p8 = pnand %p1078_p13, %p1455_p6 }
 0x217   : > { %p1084_p2 = por %p1083_p1, %p1082_p11 }
 0x218   : > { %p1080_p10 = pneg %p1079_p8 }
 0x21a   : > { %p1085_p4 = pnand %p1084_p2, %p1080_p10 }
 0x21c   : > { %1088 = shalt.err (!%p1085_p4)
}
 0x21d   : > { %890 = dma.vmem_to_hbm [thread:$0]  (%p1455_p6), %s602_s17, 128, %s599_s15, %s588_s16  }
 0x21e PF: > { %s613_s26 = sand.u32 1, %s1123_s21   ;;  %p1456_p12 = scmp.ne.s32.totalorder %s1442_s28, 0 }
 0x21f   : > { %p1457_p0 = scmp.ge.s32.totalorder %s1135_s24, 2  ;;  %s614_s30 = scalar_lea.sflag [#allocation4], %s613_s26 }
 0x221   : > { %p907_p5 = pnand %p1457_p0, %p1456_p12 }
 0x223   : > { %p908_p3 = pneg %p907_p5 }
 0x225   : > { %1118 = dma.done.wait (%p908_p3), %s614_s30, 128  }
 0x226   : > { %1120 = vsyncadd (%p908_p3), %s614_s30, 4294967168  ;;  %p21_p7 = scmp.ge.s32.totalorder %s1261_s9, 4   ;;  %s1458_s21 = smov %s1127_s22 }
 0x227   : > { %s1459_s22 = smov %s1131_s23  ;;  %s1460_s23 = smov %s1271_s11 }
 0x228   : > { %s1461_s24 = smov %s1261_s9  ;;  %23 = sbr.rel (!%p21_p7) target bundleno = 9 (0x9), region = 101 }
 0x22d   :  { %619 = vsyncpa [#allocation3], 1 }
 0x22e   :  { %621 = vsyncpa [#allocation3 + $0x1], 1 }
 0x22f   :  { %622 = vsyncpa [#allocation6], 1 }
 0x230   :  { %623 = vsyncpa [#allocation9], 1 }
 0x231   :  { %624 = vsyncpa [#allocation4], 1 }
 0x232   :  { %626 = vsyncpa [#allocation4 + $0x1], 1 }

</bundles_post_ra>
